<compile_context>
chip_gen: v7x
topology: tpu7x:2x2x1
jax: 0.10.0
libtpu: 0.0.40
codegen_flags: <defaults>
</compile_context>

<pallas_src>
import jax
import jax.numpy as jnp
from jax.experimental import pallas as pl
from jax.experimental.pallas import tpu as pltpu

LANE = 128


def attention_head_kernel(gamma_ref, x_ref, k_ref, v_ref, o_ref):
    # gamma_ref: (1,)        SMEM f32
    # x_ref:     (D, TB)     VMEM (any float dtype)
    # k_ref:     (N, D, TB)  VMEM
    # v_ref:     (N, C, TB)  VMEM
    # o_ref:     (C, TB)     VMEM f32 -- lane-dense store (TB on the lane axis)
    neg_gamma = -gamma_ref[0]

    x = x_ref[...].astype(jnp.float32)             # (D, TB)
    keys = k_ref[...].astype(jnp.float32)          # (N, D, TB)
    vals = v_ref[...].astype(jnp.float32)          # (N, C, TB)

    # Squared-distance metric; the D-reduction is a sublane accumulation.
    diff = x[None, :, :] - keys                    # (N, D, TB)
    metric = jnp.sum(diff * diff, axis=1)          # (N, TB)

    # Numerically-stable softmax logits (gamma is learned and may be negative).
    logits = metric * neg_gamma                    # (N, TB)
    m = jnp.max(logits, axis=0, keepdims=True)     # (1, TB)
    e = jnp.exp(logits - m)                        # (N, TB)

    # Deferred normalization: unnormalized weighted sum over N, then a single
    # (1, TB) reciprocal (exact, to match the f32 PyTorch module; approx=True
    # is an option if ~2e-4 relative error is acceptable, e.g. for training).
    pred = jnp.sum(e[:, None, :] * vals, axis=0)   # (C, TB)
    denom = jnp.sum(e, axis=0, keepdims=True)      # (1, TB)
    o_ref[...] = (pred * pl.reciprocal(denom)).astype(o_ref.dtype)


def _physical_vmem_bytes():
    """VMEM capacity of the local TPU; conservative fallback = v7x's 64 MiB."""
    try:
        info = pltpu.get_tpu_info()
        cap = getattr(info, "vmem_capacity_bytes", None)
        if cap:
            return int(cap)
    except Exception:
        pass
    return 64 << 20


def _pick_batch_tile(B, N, D, C, kv_itemsize, x_itemsize, out_itemsize,
                     budget_bytes):
    """Batch-lane tile (multiple of 128) sized against a VMEM budget that
    includes the double-buffered blocks *and* the in-kernel f32 temporaries,
    targeting >= 4 grid steps (>= 2 per TensorCore on megacore parts) and
    capped at 1024 lanes (~85% of HBM roofline per measured sweeps)."""
    if B % LANE != 0:
        return B                                   # single full-extent block
    pad8 = lambda v: -(-v // 8) * 8
    # Double-buffered input/output blocks, bytes per batch column (lane).
    blk = (pad8(D) * x_itemsize
           + N * pad8(D) * kv_itemsize
           + N * pad8(C) * kv_itemsize
           + pad8(C) * out_itemsize)
    # f32 in-kernel temporaries: widened keys/vals + diff, logits/e, pred.
    tmp = 4 * (2 * N * pad8(D) + N * pad8(C) + 3 * pad8(N) + pad8(C))
    per_col = 2 * blk + tmp
    max_cols = max(LANE, (budget_bytes // per_col) // LANE * LANE)
    cap = min(max_cols, 1024)
    if B // LANE >= 4:                             # keep >= 4 grid steps
        cap = min(cap, max(LANE, (B // 4) // LANE * LANE))
    t = cap
    while t >= LANE:                               # largest 128-multiple dividing B
        if B % t == 0:
            return t
        t -= LANE
    return LANE


def attention_head_forward_batch_last(x_t, keys_t, values_t, gamma, *,
                                      batch_tile=None):
    """Hot path: batch-last inputs, no per-call reformatting.

      x_t: (D, B)   keys_t: (N, D, B)   values_t: (N, C, B)  ->  (C, B) f32

    keys_t / values_t may be stored in a narrower dtype (bf16 / fp8) by the
    caller; the kernel widens to f32 in VMEM, so narrower persistent storage
    directly reduces the dominant HBM traffic without a per-call cast.
    """
    D, B = x_t.shape
    N = keys_t.shape[0]
    C = values_t.shape[1]
    assert keys_t.shape == (N, D, B)
    assert values_t.shape == (N, C, B)

    gamma_arr = jnp.asarray(gamma, jnp.float32).reshape(1)

    phys_vmem = _physical_vmem_bytes()
    vmem_limit = (phys_vmem * 3) // 4              # raised scoped limit, with headroom
    if batch_tile is None:
        batch_tile = _pick_batch_tile(
            B, N, D, C,
            kv_itemsize=jnp.dtype(keys_t.dtype).itemsize,
            x_itemsize=jnp.dtype(x_t.dtype).itemsize,
            out_itemsize=4,
            budget_bytes=vmem_limit // 2)
    assert B % batch_tile == 0
    steps = B // batch_tile

    def kv_spec(shape, index_map):
        # Deeper pipelining only pays once there are enough steps to overlap.
        if steps >= 4:
            return pl.BlockSpec(shape, index_map, pipeline_mode=pl.Buffered(3))
        return pl.BlockSpec(shape, index_map)

    return pl.pallas_call(
        attention_head_kernel,
        out_shape=jax.ShapeDtypeStruct((C, B), jnp.float32),
        grid_spec=pltpu.PrefetchScalarGridSpec(
            num_scalar_prefetch=0,
            grid=(steps,),
            in_specs=[
                # gamma: tiny array in SMEM, read as a scalar.
                pl.BlockSpec(memory_space=pltpu.MemorySpace.SMEM),
                pl.BlockSpec((D, batch_tile), lambda i: (0, i)),
                kv_spec((N, D, batch_tile), lambda i: (0, 0, i)),
                kv_spec((N, C, batch_tile), lambda i: (0, 0, i)),
            ],
            out_specs=pl.BlockSpec((C, batch_tile), lambda i: (0, i)),
        ),
        compiler_params=pltpu.CompilerParams(
            dimension_semantics=("parallel",),
            vmem_limit_bytes=int(vmem_limit)),
    )(gamma_arr, x_t, keys_t, values_t)


def attention_head_forward(x, keys, values, gamma, *, batch_tile=None):
    """Convenience wrapper with the PyTorch layout: x (B, D), keys (B, N, D),
    values (B, N, C) -> (B, C).  The transposes here are layout plumbing; for
    repeated calls store the arrays batch-last once and call
    attention_head_forward_batch_last directly."""
    out_t = attention_head_forward_batch_last(
        jnp.transpose(x, (1, 0)),
        jnp.transpose(keys, (1, 2, 0)),
        jnp.transpose(values, (1, 2, 0)),
        gamma, batch_tile=batch_tile)
    return jnp.transpose(out_t, (1, 0))


if __name__ == "__main__":
    key = jax.random.PRNGKey(0)
    kx, kk, kv = jax.random.split(key, 3)

    B, N, D, C = 16, 16, 32, 8
    x = jax.random.normal(kx, (B, D), dtype=jnp.float32)
    keys = jax.random.normal(kk, (B, N, D), dtype=jnp.float32)
    values = jax.random.normal(kv, (B, N, C), dtype=jnp.float32)

    # Deterministic parameter init: matches torch.ones(1) in __init__.
    gamma = 1.0

    out = jax.block_until_ready(attention_head_forward(x, keys, values, gamma))

    # Pure-JAX f32 reference matching the PyTorch module semantics exactly
    # (no storage quantization anymore, so compare against the true math).
    metric = jnp.sum((x[:, None, :] - keys) ** 2, axis=-1)
    att = jax.nn.softmax(-metric * gamma, axis=-1)
    ref = jnp.sum(att[..., None] * values, axis=1)

    assert out.shape == (B, C)
    assert jnp.allclose(out, ref, atol=1e-3, rtol=1e-3), "mismatch vs reference"
    print("KERNEL_OK")
</pallas_src>

<mosaic_0001>
module attributes {stable_mosaic.version = 11 : i64} {
  func.func @attention_head_kernel(%arg0: i32, %arg1: memref<1xf32, #tpu.memory_space<smem>>, %arg2: memref<32x16xf32, #tpu.memory_space<vmem>>, %arg3: memref<16x32x16xf32, #tpu.memory_space<vmem>>, %arg4: memref<16x8x16xf32, #tpu.memory_space<vmem>>, %arg5: memref<8x16xf32, #tpu.memory_space<vmem>>) attributes {dimension_semantics = [#tpu.dimension_semantics<parallel>], iteration_bounds = array<i64: 1>, scalar_prefetch = 0 : i64, scratch_operands = 0 : i64, tpu.core_type = #tpu.core_type<tc>, window_params = [{transform_indices = @transform_0, window_bounds = array<i64: 1>}, {transform_indices = @transform_1, window_bounds = array<i64: 32, 16>}, {transform_indices = @transform_2, window_bounds = array<i64: 16, 32, 16>}, {transform_indices = @transform_3, window_bounds = array<i64: 16, 8, 16>}, {transform_indices = @transform_4, window_bounds = array<i64: 8, 16>}]} {
    %c0 = arith.constant 0 : index
    %0 = memref.load %arg1[%c0] : memref<1xf32, #tpu.memory_space<smem>>
    %cst = arith.constant 0.000000e+00 : f32
    %1 = arith.subf %cst, %0 : f32
    %c0_0 = arith.constant 0 : index
    %c0_1 = arith.constant 0 : index
    %2 = vector.load %arg2[%c0_0, %c0_1] : memref<32x16xf32, #tpu.memory_space<vmem>>, vector<32x16xf32>
    %c0_2 = arith.constant 0 : index
    %c0_3 = arith.constant 0 : index
    %c0_4 = arith.constant 0 : index
    %3 = vector.load %arg3[%c0_2, %c0_3, %c0_4] : memref<16x32x16xf32, #tpu.memory_space<vmem>>, vector<16x32x16xf32>
    %c0_5 = arith.constant 0 : index
    %c0_6 = arith.constant 0 : index
    %c0_7 = arith.constant 0 : index
    %4 = vector.load %arg4[%c0_5, %c0_6, %c0_7] : memref<16x8x16xf32, #tpu.memory_space<vmem>>, vector<16x8x16xf32>
    %5 = vector.shape_cast %2 : vector<32x16xf32> to vector<1x32x16xf32>
    %6 = vector.broadcast %5 : vector<1x32x16xf32> to vector<16x32x16xf32>
    %7 = arith.subf %6, %3 : vector<16x32x16xf32>
    %8 = arith.mulf %7, %7 : vector<16x32x16xf32>
    %cst_8 = arith.constant dense<0.000000e+00> : vector<16x16xf32>
    %9 = vector.multi_reduction <add>, %8, %cst_8 [1] : vector<16x32x16xf32> to vector<16x16xf32>
    %10 = vector.broadcast %1 : f32 to vector<16x16xf32>
    %11 = arith.mulf %9, %10 : vector<16x16xf32>
    %cst_9 = arith.constant dense<0xFF800000> : vector<16xf32>
    %12 = vector.multi_reduction <maximumf>, %11, %cst_9 [0] : vector<16x16xf32> to vector<16xf32>
    %13 = vector.shape_cast %12 : vector<16xf32> to vector<1x16xf32>
    %14 = vector.broadcast %13 : vector<1x16xf32> to vector<16x16xf32>
    %15 = arith.subf %11, %14 : vector<16x16xf32>
    %16 = math.exp %15 : vector<16x16xf32>
    %17 = vector.shape_cast %16 : vector<16x16xf32> to vector<16x1x16xf32>
    %18 = vector.broadcast %17 : vector<16x1x16xf32> to vector<16x8x16xf32>
    %19 = arith.mulf %18, %4 : vector<16x8x16xf32>
    %cst_10 = arith.constant dense<0.000000e+00> : vector<8x16xf32>
    %20 = vector.multi_reduction <add>, %19, %cst_10 [0] : vector<16x8x16xf32> to vector<8x16xf32>
    %cst_11 = arith.constant dense<0.000000e+00> : vector<16xf32>
    %21 = vector.multi_reduction <add>, %16, %cst_11 [0] : vector<16x16xf32> to vector<16xf32>
    %22 = vector.shape_cast %21 : vector<16xf32> to vector<1x16xf32>
    %23 = tpu.reciprocal %22 : vector<1x16xf32> -> vector<1x16xf32>
    %24 = vector.broadcast %23 : vector<1x16xf32> to vector<8x16xf32>
    %25 = arith.mulf %20, %24 : vector<8x16xf32>
    %c0_12 = arith.constant 0 : index
    %c0_13 = arith.constant 0 : index
    %26 = vector.load %arg5[%c0_12, %c0_13] : memref<8x16xf32, #tpu.memory_space<vmem>>, vector<8x16xf32>
    tpu.vector_store %arg5[%c0_12, %c0_13], %25 {strides = array<i32>} : memref<8x16xf32, #tpu.memory_space<vmem>>, vector<8x16xf32>,
    return
  }
  func.func @transform_0(%arg0: i32) -> i32 {
    %c0_i32 = arith.constant 0 : i32
    %c0_i32_0 = arith.constant 0 : i32
    return %c0_i32 : i32
  }
  func.func @transform_1(%arg0: i32) -> (i32, i32) {
    %c0_i32 = arith.constant 0 : i32
    %c0_i32_0 = arith.constant 0 : i32
    return %c0_i32, %arg0 : i32, i32
  }
  func.func @transform_2(%arg0: i32) -> (i32, i32, i32) {
    %c0_i32 = arith.constant 0 : i32
    %c0_i32_0 = arith.constant 0 : i32
    %c0_i32_1 = arith.constant 0 : i32
    return %c0_i32, %c0_i32_0, %arg0 : i32, i32, i32
  }
  func.func @transform_3(%arg0: i32) -> (i32, i32, i32) {
    %c0_i32 = arith.constant 0 : i32
    %c0_i32_0 = arith.constant 0 : i32
    %c0_i32_1 = arith.constant 0 : i32
    return %c0_i32, %c0_i32_0, %arg0 : i32, i32, i32
  }
  func.func @transform_4(%arg0: i32) -> (i32, i32) {
    %c0_i32 = arith.constant 0 : i32
    %c0_i32_0 = arith.constant 0 : i32
    return %c0_i32, %arg0 : i32, i32
  }
}

</mosaic_0001>

<bundles_post_ra>
// kernel: tpu_custom_call.1
= control target key start
LH: loop header
LB: loop body
LE: loop exit
PB: predicated region body
PF: predicated region fallthrough
CT: control target
= control target key end

     0   :  { %10 = vsyncpa [#allocation4], 0  ;;  %vm233_vm0 = vcmask 130048   ;;  %vm666_vm1 = vcmask 1041409   ;;  %vm669_vm2 = vcmask 1042434   ;;  %vm672_vm3 = vcmask 1043459   ;;  %s1753_s0 = inlined_call_operand.<no memory space> [shape: f32[1], index: 0, kind: input, shape index: {}]   ;;  %s1754_s1 = inlined_call_operand.vmem [shape: f32[32,16], index: 1, kind: input, shape index: {}]   ;;  %s1755_s2 = inlined_call_operand.vmem [shape: f32[16,32,16], index: 2, kind: input, shape index: {}]   ;;  %s1756_s3 = inlined_call_operand.vmem [shape: f32[16,8,16], index: 3, kind: input, shape index: {}]   ;;  %s1757_s4 = inlined_call_operand.hbm [shape: f32[8,16], index: 4, kind: output, shape index: {}]  }
   0x1   :  { %s20_s17 = ssub.f32 0.0, %s1753_s0  ;;  %v823_v0 = vld [vmem:[%s1754_s1] sm:$0xff]  ;;  %v828_v1 = vld [vmem:[%s1754_s1 + $0x8] sm:$0xff]  ;;  %v833_v2 = vld [vmem:[%s1754_s1 + $0x10] sm:$0xff]  ;;  %vm675_vm4 = vcmask 1044484   ;;  %vm678_vm5 = vcmask 1045509  }
   0x2   :  { %v838_v3 = vld [vmem:[%s1754_s1 + $0x18] sm:$0xff]  ;;  %v25_v4 = vld [vmem:[%s1755_s2] sm:$0xff]  ;;  %v26_v5 = vld [vmem:[%s1755_s2 + $0x8] sm:$0xff]  ;;  %vm681_vm6 = vcmask 1046534   ;;  %vm684_vm7 = vcmask 1047559   ;;  %s791_s16 = smov [#allocation3]  }
   0x3   :  { %v27_v6 = vld [vmem:[%s1755_s2 + $0x10] sm:$0xff]  ;;  %v28_v7 = vld [vmem:[%s1755_s2 + $0x18] sm:$0xff]  ;;  %v105_v8 = vsub.f32 %v823_v0, %v25_v4  ;;  %v29_v9 = vld [vmem:[%s1755_s2 + $0x20] sm:$0xff]  ;;  %v106_v12 = vsub.f32 %v828_v1, %v26_v5  ;;  %v865_v15 = vstv %s20_s17  ;;  %s724_s18 = sshll.u32 %s791_s16, 4  ;;  %s725_s18 = int_to_ptr.vmem [resolvable:$true] %s724_s18 }
   0x4   :  { %v30_v10 = vld [vmem:[%s1755_s2 + $0x28] sm:$0xff]  ;;  %v31_v11 = vld [vmem:[%s1755_s2 + $0x30] sm:$0xff]  ;;  %v107_v13 = vsub.f32 %v833_v2, %v27_v6  ;;  %v108_v14 = vsub.f32 %v838_v3, %v28_v7  ;;  %1759 = vst [vmem:[#allocation6_spill] sm:$0xff] %v865_v15  ;;  %v32_v16 = vld [vmem:[%s1755_s2 + $0x38] sm:$0xff]  ;;  %v109_v19 = vsub.f32 %v823_v0, %v29_v9  ;;  %s767_s17 = scalar_lea.vmem %s725_s18, 128  ;;  %p772_p1 = scmp.lt.s32.totalorder %s725_s18, %s725_s18 }
   0x5   :  { %v33_v17 = vld [vmem:[%s1755_s2 + $0x40] sm:$0xff]  ;;  %v34_v18 = vld [vmem:[%s1755_s2 + $0x48] sm:$0xff]  ;;  %v110_v20 = vsub.f32 %v828_v1, %v30_v10  ;;  %v111_v21 = vsub.f32 %v833_v2, %v31_v11  ;;  %v879_v22 = vmul.f32 %v105_v8, %v105_v8  ;;  %v35_v23 = vld [vmem:[%s1755_s2 + $0x50] sm:$0xff]  ;;  %v112_v26 = vsub.f32 %v838_v3, %v32_v16  ;;  %p768_p0 = scmp.ne.s32.totalorder %s725_s18, %s767_s17  ;;  %p773_p2 = scmp.lt.s32.totalorder %s767_s17, %s767_s17 }
   0x6   :  { %v36_v24 = vld [vmem:[%s1755_s2 + $0x58] sm:$0xff]  ;;  %v37_v25 = vld [vmem:[%s1755_s2 + $0x60] sm:$0xff]  ;;  %v113_v27 = vsub.f32 %v823_v0, %v33_v17  ;;  %v114_v28 = vsub.f32 %v828_v1, %v34_v18  ;;  %v893_v29 = vmul.f32 %v106_v12, %v106_v12  ;;  %v38_v30 = vld [vmem:[%s1755_s2 + $0x68] sm:$0xff]  ;;  %v115_v33 = vsub.f32 %v833_v2, %v35_v23 }
   0x7   :  { %v39_v31 = vld [vmem:[%s1755_s2 + $0x70] sm:$0xff]  ;;  %v40_v32 = vld [vmem:[%s1755_s2 + $0x78] sm:$0xff]  ;;  %v906_v34 = vsub.f32 %v838_v3, %v36_v24  ;;  %v909_v35 = vsub.f32 %v823_v0, %v37_v25  ;;  %v911_v36 = vmul.f32 %v107_v13, %v107_v13  ;;  %v41_v37 = vld [vmem:[%s1755_s2 + $0x80] sm:$0xff]  ;;  %v923_v40 = vsub.f32 %v828_v1, %v38_v30  ;;  %p774_p3 = por %p773_p2, %p772_p1 }
   0x8   :  { %v42_v38 = vld [vmem:[%s1755_s2 + $0x88] sm:$0xff]  ;;  %v43_v39 = vld [vmem:[%s1755_s2 + $0x90] sm:$0xff]  ;;  %v926_v41 = vsub.f32 %v833_v2, %v39_v31  ;;  %v929_v42 = vsub.f32 %v838_v3, %v40_v32  ;;  %v931_v43 = vmul.f32 %v108_v14, %v108_v14  ;;  %v44_v44 = vld [vmem:[%s1755_s2 + $0x98] sm:$0xff]  ;;  %v943_v47 = vsub.f32 %v823_v0, %v41_v37 }
   0x9   :  { %v45_v45 = vld [vmem:[%s1755_s2 + $0xa0] sm:$0xff]  ;;  %v46_v46 = vld [vmem:[%s1755_s2 + $0xa8] sm:$0xff]  ;;  %v946_v48 = vsub.f32 %v828_v1, %v42_v38  ;;  %v949_v49 = vsub.f32 %v833_v2, %v43_v39  ;;  %v951_v50 = vmul.f32 %v109_v19, %v109_v19  ;;  %v47_v51 = vld [vmem:[%s1755_s2 + $0xb0] sm:$0xff]  ;;  %v963_v54 = vsub.f32 %v838_v3, %v44_v44  ;;  %p775_p4 = pnand %p774_p3, %p768_p0 }
   0xa   :  { %v48_v52 = vld [vmem:[%s1755_s2 + $0xb8] sm:$0xff]  ;;  %v49_v53 = vld [vmem:[%s1755_s2 + $0xc0] sm:$0xff]  ;;  %v966_v55 = vsub.f32 %v823_v0, %v45_v45  ;;  %v969_v56 = vsub.f32 %v828_v1, %v46_v46  ;;  %v971_v57 = vmul.f32 %v110_v20, %v110_v20  ;;  %v50_v58 = vld [vmem:[%s1755_s2 + $0xc8] sm:$0xff]  ;;  %v983_v61 = vsub.f32 %v833_v2, %v47_v51 }
   0xb   :  { %v51_v59 = vld [vmem:[%s1755_s2 + $0xd0] sm:$0xff]  ;;  %v52_v60 = vld [vmem:[%s1755_s2 + $0xd8] sm:$0xff]  ;;  %v986_v62 = vsub.f32 %v838_v3, %v48_v52  ;;  %v989_v63 = vsub.f32 %v823_v0, %v49_v53  ;;  %v991_v4 = vmul.f32 %v111_v21, %v111_v21  ;;  %v53_v5 = vld [vmem:[%s1755_s2 + $0xe0] sm:$0xff]  ;;  %v1003_v8 = vsub.f32 %v828_v1, %v50_v58 }
   0xc   :  { %v54_v6 = vld [vmem:[%s1755_s2 + $0xe8] sm:$0xff]  ;;  %v55_v7 = vld [vmem:[%s1755_s2 + $0xf0] sm:$0xff]  ;;  %v1006_v9 = vsub.f32 %v833_v2, %v51_v59  ;;  %v1009_v10 = vsub.f32 %v838_v3, %v52_v60  ;;  %v1011_v11 = vmul.f32 %v112_v26, %v112_v26  ;;  %v56_v12 = vld [vmem:[%s1755_s2 + $0xf8] sm:$0xff]  ;;  %v1023_v16 = vsub.f32 %v823_v0, %v53_v5 }
   0xd   :  { %1760 = vst [vmem:[#allocation7_spill] sm:$0xff] %v991_v4  ;;  %v57_v13 = vld [vmem:[%s1755_s2 + $0x100] sm:$0xff]  ;;  %v58_v14 = vld [vmem:[%s1755_s2 + $0x108] sm:$0xff]  ;;  %v1026_v17 = vsub.f32 %v828_v1, %v54_v6  ;;  %v1029_v18 = vsub.f32 %v833_v2, %v55_v7  ;;  %v1031_v19 = vmul.f32 %v113_v27, %v113_v27  ;;  %v59_v20 = vld [vmem:[%s1755_s2 + $0x110] sm:$0xff]  ;;  %v1043_v24 = vsub.f32 %v838_v3, %v56_v12 }
   0xe   :  { %1761 = vst [vmem:[#allocation8_spill] sm:$0xff] %v1011_v11  ;;  %v60_v21 = vld [vmem:[%s1755_s2 + $0x118] sm:$0xff]  ;;  %v61_v23 = vld [vmem:[%s1755_s2 + $0x120] sm:$0xff]  ;;  %v1046_v25 = vsub.f32 %v823_v0, %v57_v13  ;;  %v1049_v26 = vsub.f32 %v828_v1, %v58_v14  ;;  %v1051_v27 = vmul.f32 %v114_v28, %v114_v28  ;;  %v62_v30 = vld [vmem:[%s1755_s2 + $0x128] sm:$0xff]  ;;  %v1063_v37 = vsub.f32 %v833_v2, %v59_v20 }
   0xf   :  { %1762 = vst [vmem:[#allocation9_spill] sm:$0xff] %v1031_v19  ;;  %v63_v31 = vld [vmem:[%s1755_s2 + $0x130] sm:$0xff]  ;;  %v64_v32 = vld [vmem:[%s1755_s2 + $0x138] sm:$0xff]  ;;  %v1066_v38 = vsub.f32 %v838_v3, %v60_v21  ;;  %v1069_v28 = vsub.f32 %v823_v0, %v61_v23  ;;  %v1071_v39 = vmul.f32 %v115_v33, %v115_v33  ;;  %v65_v44 = vld [vmem:[%s1755_s2 + $0x140] sm:$0xff]  ;;  %v1083_v51 = vsub.f32 %v828_v1, %v62_v30 }
  0x10   :  { %1763 = vst [vmem:[#allocation10_spill] sm:$0xff] %v1051_v27  ;;  %v66_v45 = vld [vmem:[%s1755_s2 + $0x148] sm:$0xff]  ;;  %v67_v46 = vld [vmem:[%s1755_s2 + $0x150] sm:$0xff]  ;;  %v1086_v52 = vsub.f32 %v833_v2, %v63_v31  ;;  %v1089_v33 = vsub.f32 %v838_v3, %v64_v32  ;;  %v1093_v53 = vmul.f32 %v906_v34, %v906_v34  ;;  %v68_v58 = vld [vmem:[%s1755_s2 + $0x158] sm:$0xff]  ;;  %v1105_v5 = vsub.f32 %v823_v0, %v65_v44 }
  0x11   :  { %1764 = vst [vmem:[#allocation11_spill] sm:$0xff] %v1071_v39  ;;  %v69_v59 = vld [vmem:[%s1755_s2 + $0x160] sm:$0xff]  ;;  %v70_v60 = vld [vmem:[%s1755_s2 + $0x168] sm:$0xff]  ;;  %v1108_v6 = vsub.f32 %v828_v1, %v66_v45  ;;  %v1111_v34 = vsub.f32 %v833_v2, %v67_v46  ;;  %v1115_v7 = vmul.f32 %v909_v35, %v909_v35  ;;  %v71_v12 = vld [vmem:[%s1755_s2 + $0x170] sm:$0xff]  ;;  %v1127_v20 = vsub.f32 %v838_v3, %v68_v58 }
  0x12   :  { %1765 = vst [vmem:[#allocation12_spill] sm:$0xff] %v1093_v53  ;;  %v72_v13 = vld [vmem:[%s1755_s2 + $0x178] sm:$0xff]  ;;  %v73_v14 = vld [vmem:[%s1755_s2 + $0x180] sm:$0xff]  ;;  %v1130_v21 = vsub.f32 %v823_v0, %v69_v59  ;;  %v1133_v35 = vsub.f32 %v828_v1, %v70_v60  ;;  %v1137_v23 = vmul.f32 %v923_v40, %v923_v40  ;;  %v74_v30 = vld [vmem:[%s1755_s2 + $0x188] sm:$0xff]  ;;  %v1149_v44 = vsub.f32 %v833_v2, %v71_v12 }
  0x13   :  { %1766 = vst [vmem:[#allocation13_spill] sm:$0xff] %v1115_v7  ;;  %v75_v31 = vld [vmem:[%s1755_s2 + $0x190] sm:$0xff]  ;;  %v76_v32 = vld [vmem:[%s1755_s2 + $0x198] sm:$0xff]  ;;  %v1152_v45 = vsub.f32 %v838_v3, %v72_v13  ;;  %v1155_v40 = vsub.f32 %v823_v0, %v73_v14  ;;  %v1159_v46 = vmul.f32 %v926_v41, %v926_v41  ;;  %v77_v58 = vld [vmem:[%s1755_s2 + $0x1a0] sm:$0xff]  ;;  %v154_v12 = vsub.f32 %v828_v1, %v74_v30 }
  0x14   :  { %1767 = vst [vmem:[#allocation14_spill] sm:$0xff] %v1137_v23  ;;  %v78_v59 = vld [vmem:[%s1755_s2 + $0x1a8] sm:$0xff]  ;;  %v79_v60 = vld [vmem:[%s1755_s2 + $0x1b0] sm:$0xff]  ;;  %v155_v13 = vsub.f32 %v833_v2, %v75_v31  ;;  %v156_v14 = vsub.f32 %v838_v3, %v76_v32  ;;  %v1175_v41 = vmul.f32 %v929_v42, %v929_v42  ;;  %v80_v15 = vld [vmem:[%s1755_s2 + $0x1b8] sm:$0xff]  ;;  %v157_v31 = vsub.f32 %v823_v0, %v77_v58 }
  0x15   :  { %1768 = vst [vmem:[#allocation15_spill] sm:$0xff] %v1159_v46  ;;  %v81_v46 = vld [vmem:[%s1755_s2 + $0x1c0] sm:$0xff]  ;;  %v82_v30 = vld [vmem:[%s1755_s2 + $0x1c8] sm:$0xff]  ;;  %v158_v32 = vsub.f32 %v828_v1, %v78_v59  ;;  %v159_v23 = vsub.f32 %v833_v2, %v79_v60  ;;  %v1191_v42 = vmul.f32 %v943_v47, %v943_v47  ;;  %v84_v7 = vld [vmem:[%s1755_s2 + $0x1d8] sm:$0xff]  ;;  %v160_v59 = vsub.f32 %v838_v3, %v80_v15 }
  0x16   :  { %1769 = vst [vmem:[#allocation16_spill] sm:$0xff] %v1175_v41  ;;  %v83_v41 = vld [vmem:[%s1755_s2 + $0x1d0] sm:$0xff]  ;;  %v85_v58 = vld [vmem:[%s1755_s2 + $0x1e0] sm:$0xff]  ;;  %v161_v60 = vsub.f32 %v823_v0, %v81_v46  ;;  %v162_v53 = vsub.f32 %v828_v1, %v82_v30  ;;  %v1207_v47 = vmul.f32 %v946_v48, %v946_v48  ;;  %v88_v15 = vld [vmem:[%s1755_s2 + $0x1f8] sm:$0xff]  ;;  %v164_v30 = vsub.f32 %v838_v3, %v84_v7 }
  0x17   :  { %1770 = vst [vmem:[#allocation17_spill] sm:$0xff] %v1191_v42  ;;  %v86_v42 = vld [vmem:[%s1755_s2 + $0x1e8] sm:$0xff]  ;;  %v87_v39 = vld [vmem:[%s1755_s2 + $0x1f0] sm:$0xff]  ;;  %v163_v46 = vsub.f32 %v833_v2, %v83_v41  ;;  %v165_v27 = vsub.f32 %v823_v0, %v85_v58  ;;  %v1223_v48 = vmul.f32 %v949_v49, %v949_v49  ;;  %v168_v11 = vsub.f32 %v838_v3, %v88_v15  ;;  %v1780_v15 = vld [vmem:[#allocation8_spill] sm:$0xff] }
  0x18   :  { %1771 = vst [vmem:[#allocation18_spill] sm:$0xff] %v1207_v47  ;;  %v166_v47 = vsub.f32 %v828_v1, %v86_v42  ;;  %v167_v19 = vsub.f32 %v833_v2, %v87_v39  ;;  %v1230_v4 = vmul.f32 %v963_v54, %v963_v54  ;;  %v1234_v41 = vmul.f32 %v966_v55, %v966_v55 }
  0x19   :  { %v1238_v0 = vmul.f32 %v969_v56, %v969_v56  ;;  %v1242_v49 = vmul.f32 %v983_v61, %v983_v61  ;;  %v1246_v1 = vmul.f32 %v986_v62, %v986_v62  ;;  %v1250_v2 = vmul.f32 %v989_v63, %v989_v63 }
  0x1a   :  { %v1254_v3 = vmul.f32 %v1003_v8, %v1003_v8  ;;  %v1258_v54 = vmul.f32 %v1006_v9, %v1006_v9  ;;  %v1262_v55 = vmul.f32 %v1009_v10, %v1009_v10  ;;  %v1266_v56 = vmul.f32 %v1023_v16, %v1023_v16 }
  0x1b   :  { %v1270_v61 = vmul.f32 %v1026_v17, %v1026_v17  ;;  %v1274_v62 = vmul.f32 %v1029_v18, %v1029_v18  ;;  %v1278_v63 = vmul.f32 %v1043_v24, %v1043_v24  ;;  %v1282_v8 = vmul.f32 %v1046_v25, %v1046_v25 }
  0x1c   :  { %v1286_v9 = vmul.f32 %v1049_v26, %v1049_v26  ;;  %v1290_v10 = vmul.f32 %v1063_v37, %v1063_v37  ;;  %v1294_v16 = vmul.f32 %v1066_v38, %v1066_v38  ;;  %v1298_v17 = vmul.f32 %v1069_v28, %v1069_v28 }
  0x1d   :  { %v1302_v18 = vmul.f32 %v1083_v51, %v1083_v51  ;;  %v1306_v24 = vmul.f32 %v1086_v52, %v1086_v52  ;;  %v1310_v25 = vmul.f32 %v1089_v33, %v1089_v33  ;;  %v1314_v26 = vmul.f32 %v1105_v5, %v1105_v5 }
  0x1e   :  { %v1318_v37 = vmul.f32 %v1108_v6, %v1108_v6  ;;  %v1322_v38 = vmul.f32 %v1111_v34, %v1111_v34  ;;  %v1326_v28 = vmul.f32 %v1127_v20, %v1127_v20  ;;  %v1330_v39 = vmul.f32 %v1130_v21, %v1130_v21 }
  0x1f   :  { %v1334_v51 = vmul.f32 %v1133_v35, %v1133_v35  ;;  %v1338_v52 = vmul.f32 %v1149_v44, %v1149_v44  ;;  %v1342_v33 = vmul.f32 %v1152_v45, %v1152_v45  ;;  %v1346_v5 = vmul.f32 %v1155_v40, %v1155_v40 }
  0x20   :  { %v1348_v6 = vmul.f32 %v154_v12, %v154_v12  ;;  %v1350_v34 = vmul.f32 %v155_v13, %v155_v13  ;;  %v1352_v7 = vmul.f32 %v156_v14, %v156_v14  ;;  %v1354_v20 = vmul.f32 %v157_v31, %v157_v31 }
  0x21   :  { %v1356_v21 = vmul.f32 %v158_v32, %v158_v32  ;;  %v1358_v35 = vmul.f32 %v159_v23, %v159_v23  ;;  %v1360_v44 = vmul.f32 %v160_v59, %v160_v59  ;;  %v1362_v45 = vmul.f32 %v161_v60, %v161_v60 }
  0x22   :  { %v1364_v42 = vmul.f32 %v162_v53, %v162_v53  ;;  %v1366_v40 = vmul.f32 %v163_v46, %v163_v46  ;;  %v1368_v12 = vmul.f32 %v164_v30, %v164_v30  ;;  %v1370_v13 = vmul.f32 %v165_v27, %v165_v27  ;;  %v1781_v46 = vld [vmem:[#allocation9_spill] sm:$0xff]  ;;  %v1782_v30 = vld [vmem:[#allocation10_spill] sm:$0xff] }
  0x23   :  { %v1372_v14 = vmul.f32 %v166_v47, %v166_v47  ;;  %v1374_v31 = vmul.f32 %v167_v19, %v167_v19  ;;  %v1376_v32 = vmul.f32 %v168_v11, %v168_v11  ;;  %v234_v23 = vsel %vm233_vm0, %v879_v22, 0.0  ;;  %v1779_v19 = vld [vmem:[#allocation7_spill] sm:$0xff] }
  0x24   :  { %1772 = vst [vmem:[#allocation19_spill] sm:$0xff] %v1364_v42  ;;  %1773 = vst [vmem:[#allocation20_spill] sm:$0xff] %v1366_v40  ;;  %v235_v58 = vsel %vm233_vm0, %v893_v29, 0.0  ;;  %v237_v53 = vsel %vm233_vm0, %v911_v36, 0.0  ;;  %v239_v59 = vsel %vm233_vm0, %v931_v43, 0.0  ;;  %v247_v60 = vsel %vm233_vm0, %v951_v50, 0.0 }
  0x25   :  { %1774 = vst [vmem:[#allocation21_spill] sm:$0xff] %v1368_v12  ;;  %1775 = vst [vmem:[#allocation22_spill] sm:$0xff] %v1370_v13  ;;  %v236_v27 = vadd.f32 %v235_v58, %v234_v23  ;;  %v248_v11 = vsel %vm233_vm0, %v971_v57, 0.0  ;;  %v250_v47 = vsel %vm233_vm0, %v1779_v19, 0.0  ;;  %v252_v29 = vsel %vm233_vm0, %v1780_v15, 0.0  ;;  %v1785_v19 = vld [vmem:[#allocation13_spill] sm:$0xff] }
  0x26   :  { %1776 = vst [vmem:[#allocation23_spill] sm:$0xff] %v1372_v14  ;;  %1777 = vst [vmem:[#allocation24_spill] sm:$0xff] %v1374_v31  ;;  %v249_v22 = vadd.f32 %v248_v11, %v247_v60  ;;  %v260_v36 = vsel %vm233_vm0, %v1781_v46, 0.0  ;;  %v261_v43 = vsel %vm233_vm0, %v1782_v30, 0.0  ;;  %v1784_v31 = vld [vmem:[#allocation12_spill] sm:$0xff]  ;;  %v273_v60 = vsel %vm233_vm0, %v1785_v19, 0.0 }
  0x27   :  { %1778 = vst [vmem:[#allocation25_spill] sm:$0xff] %v1376_v32  ;;  %v238_v23 = vadd.f32 %v237_v53, %v236_v27  ;;  %v262_v58 = vadd.f32 %v261_v43, %v260_v36  ;;  %v1783_v32 = vld [vmem:[#allocation11_spill] sm:$0xff]  ;;  %v265_v57 = vsel %vm233_vm0, %v1784_v31, 0.0  ;;  %v1786_v11 = vld [vmem:[#allocation14_spill] sm:$0xff]  ;;  %v1788_v27 = vld [vmem:[#allocation16_spill] sm:$0xff]  ;;  %v289_v19 = vsel %vm233_vm0, %v1223_v48, 0.0 }
  0x28   :  { %v263_v50 = vsel %vm233_vm0, %v1783_v32, 0.0  ;;  %v251_v14 = vadd.f32 %v250_v47, %v249_v22  ;;  %v274_v15 = vsel %vm233_vm0, %v1786_v11, 0.0  ;;  %v1787_v13 = vld [vmem:[#allocation15_spill] sm:$0xff]  ;;  %v278_v36 = vsel %vm233_vm0, %v1788_v27, 0.0  ;;  %v1789_v43 = vld [vmem:[#allocation17_spill] sm:$0xff]  ;;  %v1790_v47 = vld [vmem:[#allocation18_spill] sm:$0xff] }
  0x29   :  { %v276_v46 = vsel %vm233_vm0, %v1787_v13, 0.0  ;;  %v240_v12 = vadd.f32 %v239_v59, %v238_v23  ;;  %v264_v30 = vadd.f32 %v263_v50, %v262_v58  ;;  %v275_v53 = vadd.f32 %v274_v15, %v273_v60 }
  0x2a   :  { %v253_v32 = vadd.f32 %v252_v29, %v251_v14  ;;  %v286_v31 = vsel %vm233_vm0, %v1789_v43, 0.0  ;;  %v287_v22 = vsel %vm233_vm0, %v1790_v47, 0.0  ;;  %v291_v23 = vsel %vm233_vm0, %v1230_v4, 0.0 }
  0x2b   :  { %v241_v11 = vrot.slane %v240_v12, 4  ;;  %v266_v40 = vadd.f32 %v265_v57, %v264_v30  ;;  %v277_v42 = vadd.f32 %v276_v46, %v275_v53  ;;  %v288_v13 = vadd.f32 %v287_v22, %v286_v31 }
  0x2c   :  { %v254_v59 = vrot.slane %v253_v32, 4  ;;  %v299_v14 = vsel %vm233_vm0, %v1234_v41, 0.0  ;;  %v300_v29 = vsel %vm233_vm0, %v1238_v0, 0.0  ;;  %v302_v57 = vsel %vm233_vm0, %v1242_v49, 0.0 }
  0x2d   :  { %v242_v58 = vadd.f32 %v241_v11, %v240_v12  ;;  %v267_v50 = vrot.slane %v266_v40, 4  ;;  %v279_v60 = vadd.f32 %v278_v36, %v277_v42  ;;  %v290_v15 = vadd.f32 %v289_v19, %v288_v13 }
  0x2e   :  { %v255_v27 = vadd.f32 %v254_v59, %v253_v32  ;;  %v301_v48 = vadd.f32 %v300_v29, %v299_v14  ;;  %v304_v46 = vsel %vm233_vm0, %v1246_v1, 0.0  ;;  %v312_v0 = vsel %vm233_vm0, %v1250_v2, 0.0 }
  0x2f   :  { %v243_v30 = vrot.slane %v242_v58, 2  ;;  %v268_v4 = vadd.f32 %v267_v50, %v266_v40  ;;  %v280_v53 = vrot.slane %v279_v60, 4  ;;  %v292_v43 = vadd.f32 %v291_v23, %v290_v15 }
  0x30   :  { %v256_v41 = vrot.slane %v255_v27, 2  ;;  %v303_v31 = vadd.f32 %v302_v57, %v301_v48  ;;  %v313_v42 = vsel %vm233_vm0, %v1254_v3, 0.0  ;;  %v315_v1 = vsel %vm233_vm0, %v1258_v54, 0.0 }
  0x31   :  { %v244_v12 = vadd.f32 %v243_v30, %v242_v58  ;;  %v269_v36 = vrot.slane %v268_v4, 2  ;;  %v281_v32 = vadd.f32 %v280_v53, %v279_v60  ;;  %v293_v47 = vrot.slane %v292_v43, 4 }
  0x32   :  { %v257_v49 = vadd.f32 %v256_v41, %v255_v27  ;;  %v305_v22 = vadd.f32 %v304_v46, %v303_v31  ;;  %v314_v19 = vadd.f32 %v313_v42, %v312_v0  ;;  %v317_v3 = vsel %vm233_vm0, %v1262_v55, 0.0 }
  0x33   :  { %v245_v40 = vrot.slane %v244_v12, 1  ;;  %v270_v11 = vadd.f32 %v269_v36, %v268_v4  ;;  %v282_v13 = vrot.slane %v281_v32, 2  ;;  %v294_v59 = vadd.f32 %v293_v47, %v292_v43 }
  0x34   :  { %v258_v23 = vrot.slane %v257_v49, 1  ;;  %v306_v14 = vrot.slane %v305_v22, 4  ;;  %v316_v2 = vadd.f32 %v315_v1, %v314_v19  ;;  %v325_v54 = vsel %vm233_vm0, %v1266_v56, 0.0 }
  0x35   :  { %v1434_v29 = vadd.f32 %v245_v40, %v244_v12  ;;  %v271_v58 = vrot.slane %v270_v11, 1  ;;  %v283_v50 = vadd.f32 %v282_v13, %v281_v32  ;;  %v295_v60 = vrot.slane %v294_v59, 2 }
  0x36   :  { %v1436_v15 = vadd.f32 %v258_v23, %v257_v49  ;;  %v307_v27 = vadd.f32 %v306_v14, %v305_v22  ;;  %v318_v48 = vadd.f32 %v317_v3, %v316_v2  ;;  %v326_v4 = vsel %vm233_vm0, %v1270_v61, 0.0 }
  0x37   :  { %v1440_v57 = vadd.f32 %v271_v58, %v270_v11  ;;  %v284_v46 = vrot.slane %v283_v50, 1  ;;  %v296_v30 = vadd.f32 %v295_v60, %v294_v59  ;;  %v327_v43 = vadd.f32 %v326_v4, %v325_v54 }
  0x38   :  { %v308_v55 = vrot.slane %v307_v27, 2  ;;  %v319_v53 = vrot.slane %v318_v48, 4  ;;  %v328_v41 = vsel %vm233_vm0, %v1274_v62, 0.0  ;;  %v330_v42 = vsel %vm233_vm0, %v1278_v63, 0.0 }
  0x39   :  { %v1446_v31 = vadd.f32 %v284_v46, %v283_v50  ;;  %v297_v0 = vrot.slane %v296_v30, 1  ;;  %v338_v56 = vsel %vm233_vm0, %v1282_v8, 0.0  ;;  %v329_v32 = vadd.f32 %v328_v41, %v327_v43 }
  0x3a   :  { %v309_v12 = vadd.f32 %v308_v55, %v307_v27  ;;  %v320_v36 = vadd.f32 %v319_v53, %v318_v48  ;;  %v339_v61 = vsel %vm233_vm0, %v1286_v9, 0.0  ;;  %v341_v62 = vsel %vm233_vm0, %v1290_v10, 0.0 }
  0x3b   :  { %v1454_v47 = vadd.f32 %v297_v0, %v296_v30  ;;  %v340_v49 = vadd.f32 %v339_v61, %v338_v56  ;;  %v343_v22 = vsel %vm233_vm0, %v1294_v16, 0.0  ;;  %v331_v1 = vadd.f32 %v330_v42, %v329_v32 }
  0x3c   :  { %v310_v19 = vrot.slane %v309_v12, 1  ;;  %v321_v63 = vrot.slane %v320_v36, 2  ;;  %v351_v8 = vsel %vm233_vm0, %v1298_v17, 0.0  ;;  %v352_v11 = vsel %vm233_vm0, %v1302_v18, 0.0 }
  0x3d   :  { %v342_v40 = vadd.f32 %v341_v62, %v340_v49  ;;  %v354_v9 = vsel %vm233_vm0, %v1306_v24, 0.0  ;;  %v356_v13 = vsel %vm233_vm0, %v1310_v25, 0.0  ;;  %v332_v16 = vrot.slane %v331_v1, 4 }
  0x3e   :  { %v1468_v10 = vadd.f32 %v310_v19, %v309_v12  ;;  %v322_v59 = vadd.f32 %v321_v63, %v320_v36  ;;  %v353_v23 = vadd.f32 %v352_v11, %v351_v8  ;;  %v364_v2 = vsel %vm233_vm0, %v1314_v26, 0.0 }
  0x3f   :  { %v344_v14 = vadd.f32 %v343_v22, %v342_v40  ;;  %v365_v17 = vsel %vm233_vm0, %v1318_v37, 0.0  ;;  %v367_v18 = vsel %vm233_vm0, %v1322_v38, 0.0  ;;  %v333_v24 = vadd.f32 %v332_v16, %v331_v1 }
  0x40   :  { %v323_v3 = vrot.slane %v322_v59, 1  ;;  %v355_v58 = vadd.f32 %v354_v9, %v353_v23  ;;  %v366_v50 = vadd.f32 %v365_v17, %v364_v2  ;;  %v369_v60 = vsel %vm233_vm0, %v1326_v28, 0.0  ;;  %v1791_v17 = vld [vmem:[#allocation19_spill] sm:$0xff] }
  0x41   :  { %v345_v25 = vrot.slane %v344_v14, 4  ;;  %v377_v27 = vsel %vm233_vm0, %v1330_v39, 0.0  ;;  %v378_v26 = vsel %vm233_vm0, %v1334_v51, 0.0  ;;  %v334_v37 = vrot.slane %v333_v24, 2 }
  0x42   :  { %v1482_v48 = vadd.f32 %v323_v3, %v322_v59  ;;  %v357_v54 = vadd.f32 %v356_v13, %v355_v58  ;;  %v368_v46 = vadd.f32 %v367_v18, %v366_v50  ;;  %v379_v30 = vadd.f32 %v378_v26, %v377_v27  ;;  %v1792_v18 = vld [vmem:[#allocation20_spill] sm:$0xff]  ;;  %v1794_v26 = vld [vmem:[#allocation22_spill] sm:$0xff] }
  0x43   :  { %v346_v38 = vadd.f32 %v345_v25, %v344_v14  ;;  %v380_v4 = vsel %vm233_vm0, %v1338_v52, 0.0  ;;  %v382_v55 = vsel %vm233_vm0, %v1342_v33, 0.0  ;;  %v335_v28 = vadd.f32 %v334_v37, %v333_v24  ;;  %v1793_v24 = vld [vmem:[#allocation21_spill] sm:$0xff] }
  0x44   :  { %v358_v53 = vrot.slane %v357_v54, 4  ;;  %v370_v43 = vadd.f32 %v369_v60, %v368_v46  ;;  %v390_v39 = vsel %vm233_vm0, %v1346_v5, 0.0  ;;  %v381_v41 = vadd.f32 %v380_v4, %v379_v30 }
  0x45   :  { %v347_v51 = vrot.slane %v346_v38, 2  ;;  %v391_v0 = vsel %vm233_vm0, %v1348_v6, 0.0  ;;  %v393_v42 = vsel %vm233_vm0, %v1350_v34, 0.0  ;;  %v336_v56 = vrot.slane %v335_v28, 1 }
  0x46   :  { %v359_v12 = vadd.f32 %v358_v53, %v357_v54  ;;  %v371_v52 = vrot.slane %v370_v43, 4  ;;  %v392_v36 = vadd.f32 %v391_v0, %v390_v39  ;;  %v383_v33 = vadd.f32 %v382_v55, %v381_v41  ;;  %v1795_v54 = vld [vmem:[#allocation23_spill] sm:$0xff] }
  0x47   :  { %v348_v32 = vadd.f32 %v347_v51, %v346_v38  ;;  %v395_v61 = vsel %vm233_vm0, %v1352_v7, 0.0  ;;  %v403_v5 = vsel %vm233_vm0, %v1354_v20, 0.0  ;;  %v337_v49 = vadd.f32 %v336_v56, %v335_v28  ;;  %v1797_v51 = vld [vmem:[#allocation25_spill] sm:$0xff] }
  0x48   :  { %v360_v62 = vrot.slane %v359_v12, 2  ;;  %v372_v22 = vadd.f32 %v371_v52, %v370_v43  ;;  %v394_v19 = vadd.f32 %v393_v42, %v392_v36  ;;  %v384_v63 = vrot.slane %v383_v33, 4  ;;  %v1796_v43 = vld [vmem:[#allocation24_spill] sm:$0xff] }
  0x49   :  { %v349_v6 = vrot.slane %v348_v32, 1  ;;  %v404_v34 = vsel %vm233_vm0, %v1356_v21, 0.0  ;;  %v406_v1 = vsel %vm233_vm0, %v1358_v35, 0.0  ;;  %v408_v20 = vsel %vm233_vm0, %v1360_v44, 0.0 }
  0x4a   :  { %v361_v8 = vadd.f32 %v360_v62, %v359_v12  ;;  %v373_v40 = vrot.slane %v372_v22, 2  ;;  %v396_v11 = vadd.f32 %v395_v61, %v394_v19  ;;  %v405_v9 = vadd.f32 %v404_v34, %v403_v5  ;;  %v1798_v12 = vld [vmem:[#allocation6_spill] sm:$0xff] }
  0x4b   :  { %v350_v7 = vadd.f32 %v349_v6, %v348_v32  ;;  %v385_v13 = vadd.f32 %v384_v63, %v383_v33  ;;  %v416_v59 = vsel %vm233_vm0, %v1362_v45, 0.0  ;;  %v417_v35 = vsel %vm233_vm0, %v1791_v17, 0.0 }
  0x4c   :  { %v362_v16 = vrot.slane %v361_v8, 1  ;;  %v374_v23 = vadd.f32 %v373_v40, %v372_v22  ;;  %v397_v14 = vrot.slane %v396_v11, 4  ;;  %v407_v2 = vadd.f32 %v406_v1, %v405_v9 }
  0x4d   :  { %v386_v21 = vrot.slane %v385_v13, 2  ;;  %v419_v3 = vsel %vm233_vm0, %v1792_v18, 0.0  ;;  %v421_v58 = vsel %vm233_vm0, %v1793_v24, 0.0  ;;  %v418_v45 = vadd.f32 %v417_v35, %v416_v59 }
  0x4e   :  { %v363_v50 = vadd.f32 %v362_v16, %v361_v8  ;;  %v375_v25 = vrot.slane %v374_v23, 1  ;;  %v398_v44 = vadd.f32 %v397_v14, %v396_v11  ;;  %v409_v60 = vadd.f32 %v408_v20, %v407_v2 }
  0x4f   :  { %v387_v27 = vadd.f32 %v386_v21, %v385_v13  ;;  %v429_v37 = vsel %vm233_vm0, %v1794_v26, 0.0  ;;  %v430_v46 = vsel %vm233_vm0, %v1795_v54, 0.0  ;;  %v420_v53 = vadd.f32 %v419_v3, %v418_v45 }
  0x50   :  { %v376_v38 = vadd.f32 %v375_v25, %v374_v23  ;;  %v399_v30 = vrot.slane %v398_v44, 2  ;;  %v410_v4 = vrot.slane %v409_v60, 4  ;;  %v431_v55 = vadd.f32 %v430_v46, %v429_v37 }
  0x51   :  { %v388_v28 = vrot.slane %v387_v27, 1  ;;  %v432_v39 = vsel %vm233_vm0, %v1796_v43, 0.0  ;;  %v434_v41 = vsel %vm233_vm0, %v1797_v51, 0.0  ;;  %v1522_v52 = vmul.f32 %v1798_v12, %v1434_v29 }
  0x52   :  { %v400_v0 = vadd.f32 %v399_v30, %v398_v44  ;;  %v411_v42 = vadd.f32 %v410_v4, %v409_v60  ;;  %v433_v56 = vadd.f32 %v432_v39, %v431_v55  ;;  %v422_v32 = vadd.f32 %v421_v58, %v420_v53 }
  0x53   :  { %v389_v36 = vadd.f32 %v388_v28, %v387_v27  ;;  %v1526_v33 = vmul.f32 %v1798_v12, %v1436_v15  ;;  %v1530_v61 = vmul.f32 %v1798_v12, %v1440_v57  ;;  %v1534_v19 = vmul.f32 %v1798_v12, %v1446_v31 }
  0x54   :  { %v401_v5 = vrot.slane %v400_v0, 1  ;;  %v412_v62 = vrot.slane %v411_v42, 2  ;;  %v435_v22 = vadd.f32 %v434_v41, %v433_v56  ;;  %v423_v6 = vrot.slane %v422_v32, 4 }
  0x55   :  { %v1538_v29 = vmul.f32 %v1798_v12, %v1454_v47  ;;  %v1542_v15 = vmul.f32 %v1798_v12, %v1468_v10  ;;  %v1546_v57 = vmul.f32 %v1798_v12, %v1482_v48  ;;  %v1549_v8 = vmul.f32 %v1798_v12, %v337_v49 }
  0x56   :  { %v402_v63 = vadd.f32 %v401_v5, %v400_v0  ;;  %v413_v34 = vadd.f32 %v412_v62, %v411_v42  ;;  %v436_v1 = vrot.slane %v435_v22, 4  ;;  %v424_v31 = vadd.f32 %v423_v6, %v422_v32 }
  0x57   :  { %v1552_v40 = vmul.f32 %v1798_v12, %v350_v7  ;;  %v1555_v47 = vmul.f32 %v1798_v12, %v363_v50  ;;  %v1558_v10 = vmul.f32 %v1798_v12, %v376_v38  ;;  %v1561_v48 = vmul.f32 %v1798_v12, %v389_v36 }
  0x58   :  { %v414_v11 = vrot.slane %v413_v34, 1  ;;  %v437_v9 = vadd.f32 %v436_v1, %v435_v22  ;;  %v1564_v13 = vmul.f32 %v1798_v12, %v402_v63  ;;  %v425_v49 = vrot.slane %v424_v31, 2 }
  0x59   :  { %v459_v20 = vsel %vm233_vm0, %v1522_v52, -inf  ;;  %v460_v7 = vsel %vm233_vm0, %v1526_v33, -inf  ;;  %v461_v59 = vsel %vm233_vm0, %v1530_v61, -inf  ;;  %v462_v14 = vsel %vm233_vm0, %v1534_v19, -inf }
  0x5a   :  { %v415_v16 = vadd.f32 %v414_v11, %v413_v34  ;;  %v438_v23 = vrot.slane %v437_v9, 2  ;;  %v463_v2 = vsel %vm233_vm0, %v1538_v29, -inf  ;;  %v426_v21 = vadd.f32 %v425_v49, %v424_v31 }
  0x5b   :  { %v464_v17 = vmax.f32 %v459_v20, %v463_v2  ;;  %v465_v35 = vsel %vm233_vm0, %v1542_v15, -inf  ;;  %v467_v18 = vsel %vm233_vm0, %v1546_v57, -inf  ;;  %v469_v44 = vsel %vm233_vm0, %v1549_v8, -inf }
  0x5c   :  { %v439_v3 = vadd.f32 %v438_v23, %v437_v9  ;;  %v1581_v24 = vmul.f32 %v1798_v12, %v415_v16  ;;  %v466_v58 = vmax.f32 %v460_v7, %v465_v35  ;;  %v468_v50 = vmax.f32 %v461_v59, %v467_v18 }
  0x5d   :  { %v427_v25 = vrot.slane %v426_v21, 1  ;;  %v471_v60 = vsel %vm233_vm0, %v1552_v40, -inf  ;;  %v473_v27 = vsel %vm233_vm0, %v1555_v47, -inf  ;;  %v470_v26 = vmax.f32 %v462_v14, %v469_v44  ;;  %v91_v44 = vld [vmem:[%s1756_s3 + $0x10] sm:$0xff] }
  0x5e   :  { %v440_v45 = vrot.slane %v439_v3, 1  ;;  %v472_v37 = vmax.f32 %v464_v17, %v471_v60  ;;  %v474_v54 = vmax.f32 %v466_v58, %v473_v27  ;;  %v475_v38 = vsel %vm233_vm0, %v1558_v10, -inf }
  0x5f   :  { %v428_v46 = vadd.f32 %v427_v25, %v426_v21  ;;  %v477_v30 = vsel %vm233_vm0, %v1561_v48, -inf  ;;  %v479_v4 = vsel %vm233_vm0, %v1564_v13, -inf  ;;  %v476_v28 = vmax.f32 %v468_v50, %v475_v38 }
  0x60   :  { %v441_v55 = vadd.f32 %v440_v45, %v439_v3  ;;  %v478_v43 = vmax.f32 %v470_v26, %v477_v30  ;;  %v480_v39 = vmax.f32 %v472_v37, %v479_v4  ;;  %v481_v51 = vsel %vm233_vm0, %v1581_v24, -inf  ;;  %v92_v37 = vld [vmem:[%s1756_s3 + $0x18] sm:$0xff]  ;;  %v93_v4 = vld [vmem:[%s1756_s3 + $0x20] sm:$0xff] }
  0x61   :  { %v1596_v53 = vmul.f32 %v1798_v12, %v428_v46  ;;  %v482_v0 = vmax.f32 %v474_v54, %v481_v51 }
  0x62   :  { %v1601_v41 = vmul.f32 %v1798_v12, %v441_v55 }
  0x63   :  { %v483_v42 = vsel %vm233_vm0, %v1596_v53, -inf  ;;  %v487_v5 = vmax.f32 %v480_v39, %v482_v0  ;;  %v94_v39 = vld [vmem:[%s1756_s3 + $0x28] sm:$0xff] }
  0x64   :  { %v484_v56 = vmax.f32 %v476_v28, %v483_v42  ;;  %v485_v36 = vsel %vm233_vm0, %v1601_v41, -inf }
  0x65   :  { %v486_v32 = vmax.f32 %v478_v43, %v485_v36 }
  0x67   :  { %v488_v62 = vmax.f32 %v484_v56, %v486_v32 }
  0x69   :  { %v1607_v22 = vmax.f32 %v487_v5, %v488_v62 }
  0x6b   :  { %v490_v6 = vsub.f32 %v1522_v52, %v1607_v22  ;;  %v491_v12 = vsub.f32 %v1526_v33, %v1607_v22  ;;  %v492_v63 = vsub.f32 %v1530_v61, %v1607_v22  ;;  %v493_v34 = vsub.f32 %v1534_v19, %v1607_v22 }
  0x6c   :  { %v494_v1 = vsub.f32 %v1538_v29, %v1607_v22  ;;  %v495_v31 = vsub.f32 %v1542_v15, %v1607_v22  ;;  %v496_v11 = vsub.f32 %v1546_v57, %v1607_v22  ;;  %v538_v33 = vlaneseq }
  0x6d   :  { %v506_v9 = vmul.f32 1.442695, %v490_v6  ;;  %v508_v52 = vmul.f32 1.442695, %v491_v12  ;;  %v510_v49 = vmul.f32 1.442695, %v492_v63  ;;  %v497_v61 = vsub.f32 %v1549_v8, %v1607_v22 }
  0x6e   :  { %v512_v20 = vmul.f32 1.442695, %v493_v34  ;;  %v514_v7 = vmul.f32 1.442695, %v494_v1  ;;  %v516_v19 = vmul.f32 1.442695, %v495_v31  ;;  %v498_v29 = vsub.f32 %v1552_v40, %v1607_v22 }
  0x6f   :  { %733 = vpow2.f32 %v506_v9  ;;  %v518_v15 = vmul.f32 1.442695, %v496_v11  ;;  %v499_v57 = vsub.f32 %v1555_v47, %v1607_v22  ;;  %v539_v59 = vshrl.u32 %v538_v33, 7 }
  0x70   :  { %735 = vpow2.f32 %v508_v52  ;;  %v500_v16 = vsub.f32 %v1558_v10, %v1607_v22  ;;  %v520_v23 = vmul.f32 1.442695, %v497_v61  ;;  %v501_v8 = vsub.f32 %v1561_v48, %v1607_v22  ;;  %v89_v48 = vld [vmem:[%s1756_s3] sm:$0xff]  ;;  %v96_v61 = vld [vmem:[%s1756_s3 + $0x38] sm:$0xff] }
  0x71   :  { %737 = vpow2.f32 %v510_v49  ;;  %v502_v14 = vsub.f32 %v1564_v13, %v1607_v22  ;;  %v522_v40 = vmul.f32 1.442695, %v498_v29  ;;  %v524_v2 = vmul.f32 1.442695, %v499_v57 }
  0x72   :  { %739 = vpow2.f32 %v512_v20  ;;  %v1635_v21 = vsub.s32 0, %v539_v59  ;;  %v503_v47 = vsub.f32 %v1581_v24, %v1607_v22  ;;  %v526_v17 = vmul.f32 1.442695, %v500_v16  ;;  %v90_v24 = vld [vmem:[%s1756_s3 + $0x8] sm:$0xff] }
  0x73   :  { %741 = vpow2.f32 %v514_v7  ;;  %v504_v10 = vsub.f32 %v1596_v53, %v1607_v22  ;;  %v528_v35 = vmul.f32 1.442695, %v501_v8  ;;  %v505_v13 = vsub.f32 %v1601_v41, %v1607_v22  ;;  %v95_v22 = vld [vmem:[%s1756_s3 + $0x30] sm:$0xff] }
  0x74   :  { %743 = vpow2.f32 %v516_v19  ;;  %v530_v3 = vmul.f32 1.442695, %v502_v14  ;;  %v532_v60 = vmul.f32 1.442695, %v503_v47 }
  0x75   :  { %745 = vpow2.f32 %v518_v15  ;;  %v534_v54 = vmul.f32 1.442695, %v504_v10  ;;  %v536_v55 = vmul.f32 1.442695, %v505_v13  ;;  %v98_v13 = vld [vmem:[%s1756_s3 + $0x48] sm:$0xff] }
  0x76   :  { %747 = vpow2.f32 %v520_v23 }
  0x77   :  { %749 = vpow2.f32 %v522_v40 }
  0x78   :  { %751 = vpow2.f32 %v524_v2 }
  0x79   :  { %v734_v18 = vpop.eup %733  ;;  %753 = vpow2.f32 %v526_v17  ;;  %v97_v17 = vld [vmem:[%s1756_s3 + $0x40] sm:$0xff] }
  0x7a   :  { %v736_v58 = vpop.eup %735  ;;  %v541_v50 = vrot.slane %v734_v18, %v1635_v21  ;;  %755 = vpow2.f32 %v528_v35 }
  0x7b   :  { %v738_v25 = vpop.eup %737  ;;  %v545_v27 = vrot.slane %v736_v58, %v1635_v21  ;;  %v665_v45 = vrot.slane %v736_v58, 7  ;;  %757 = vpow2.f32 %v530_v3 }
  0x7c   :  { %v740_v26 = vpop.eup %739  ;;  %v549_v46 = vrot.slane %v738_v25, %v1635_v21  ;;  %v602_v38 = vmul.f32 %v541_v50, %v89_v48  ;;  %v668_v42 = vrot.slane %v738_v25, 6  ;;  %759 = vpow2.f32 %v532_v60 }
  0x7d   :  { %v742_v30 = vpop.eup %741  ;;  %v553_v28 = vrot.slane %v740_v26, %v1635_v21  ;;  %v603_v53 = vmul.f32 %v545_v27, %v90_v24  ;;  %v667_v62 = vsel %vm666_vm1, %v665_v45, %v734_v18  ;;  %v671_v9 = vrot.slane %v740_v26, 5 }
  0x7e   :  { %v744_v43 = vpop.eup %743  ;;  %v557_v51 = vrot.slane %v742_v30, %v1635_v21  ;;  %v604_v41 = vmul.f32 %v549_v46, %v91_v44  ;;  %v618_v0 = vsel %vm233_vm0, %v602_v38, 0.0  ;;  %761 = vpow2.f32 %v534_v54 }
  0x7f   :  { %v746_v56 = vpop.eup %745  ;;  %v561_v36 = vrot.slane %v744_v43, %v1635_v21  ;;  %v605_v32 = vmul.f32 %v553_v28, %v92_v37  ;;  %v619_v5 = vsel %vm233_vm0, %v603_v53, 0.0  ;;  %v670_v20 = vsel %vm669_vm2, %v668_v42, %v667_v62 }
  0x80   :  { %v565_v6 = vrot.slane %v746_v56, %v1635_v21  ;;  %v606_v12 = vmul.f32 %v557_v51, %v93_v4  ;;  %v620_v63 = vadd.f32 %v619_v5, %v618_v0  ;;  %v621_v34 = vsel %vm233_vm0, %v604_v41, 0.0  ;;  %v748_v1 = vpop.eup %747  ;;  %v99_v51 = vld [vmem:[%s1756_s3 + $0x50] sm:$0xff] }
  0x81   :  { %v607_v31 = vmul.f32 %v561_v36, %v94_v39  ;;  %v623_v11 = vsel %vm233_vm0, %v605_v32, 0.0  ;;  %v569_v52 = vrot.slane %v748_v1, %v1635_v21  ;;  %v750_v33 = vpop.eup %749  ;;  %763 = vpow2.f32 %v536_v55 }
  0x82   :  { %v622_v49 = vadd.f32 %v621_v34, %v620_v63  ;;  %v608_v7 = vmul.f32 %v565_v6, %v95_v22  ;;  %v625_v19 = vsel %vm233_vm0, %v606_v12, 0.0  ;;  %v752_v29 = vpop.eup %751  ;;  %v673_v16 = vsel %vm672_vm3, %v671_v9, %v670_v20  ;;  %v100_v63 = vld [vmem:[%s1756_s3 + $0x58] sm:$0xff] }
  0x83   :  { %v754_v57 = vpop.eup %753  ;;  %v627_v59 = vsel %vm233_vm0, %v607_v31, 0.0  ;;  %v674_v23 = vrot.slane %v742_v30, 4  ;;  %v573_v14 = vrot.slane %v750_v33, %v1635_v21  ;;  %v609_v40 = vmul.f32 %v569_v52, %v96_v61  ;;  %v101_v61 = vld [vmem:[%s1756_s3 + $0x60] sm:$0xff] }
  0x84   :  { %v624_v15 = vadd.f32 %v623_v11, %v622_v49  ;;  %v756_v8 = vpop.eup %755  ;;  %v629_v10 = vsel %vm233_vm0, %v608_v7, 0.0  ;;  %v577_v35 = vrot.slane %v752_v29, %v1635_v21  ;;  %v677_v3 = vrot.slane %v744_v43, 3 }
  0x85   :  { %v758_v47 = vpop.eup %757  ;;  %v676_v48 = vsel %vm675_vm4, %v674_v23, %v673_v16  ;;  %v610_v58 = vmul.f32 %v573_v14, %v97_v17  ;;  %v631_v50 = vsel %vm233_vm0, %v609_v40, 0.0  ;;  %v680_v25 = vrot.slane %v746_v56, 2  ;;  %v102_v16 = vld [vmem:[%s1756_s3 + $0x68] sm:$0xff]  ;;  %v103_v17 = vld [vmem:[%s1756_s3 + $0x70] sm:$0xff] }
  0x86   :  { %v626_v2 = vadd.f32 %v625_v19, %v624_v15  ;;  %v760_v44 = vpop.eup %759  ;;  %v679_v60 = vsel %vm678_vm5, %v677_v3, %v676_v48  ;;  %v581_v45 = vrot.slane %v754_v57, %v1635_v21  ;;  %v611_v26 = vmul.f32 %v577_v35, %v98_v13 }
  0x87   :  { %v683_v37 = vrot.slane %v748_v1, 1  ;;  %v686_v54 = vrot.slane %v752_v29, 7  ;;  %v682_v30 = vsel %vm681_vm6, %v680_v25, %v679_v60  ;;  %v688_v4 = vrot.slane %v754_v57, 6 }
  0x88   :  { %v628_v18 = vadd.f32 %v627_v59, %v626_v2  ;;  %v762_v27 = vpop.eup %761  ;;  %v690_v55 = vrot.slane %v756_v8, 5  ;;  %v633_v28 = vsel %vm233_vm0, %v610_v58, 0.0  ;;  %v692_v43 = vrot.slane %v758_v47, 4  ;;  %v104_v58 = vld [vmem:[%s1756_s3 + $0x78] sm:$0xff] }
  0x89   :  { %v687_v53 = vsel %vm666_vm1, %v686_v54, %v750_v33  ;;  %v694_v39 = vrot.slane %v760_v44, 3  ;;  %v696_v0 = vrot.slane %v762_v27, 2  ;;  %v685_v42 = vsel %vm684_vm7, %v683_v37, %v682_v30 }
  0x8a   :  { %v630_v24 = vadd.f32 %v629_v10, %v628_v18  ;;  %v689_v41 = vsel %vm669_vm2, %v688_v4, %v687_v53  ;;  %v585_v62 = vrot.slane %v756_v8, %v1635_v21  ;;  %v612_v22 = vmul.f32 %v581_v45, %v99_v51 }
  0x8b   :  { %v764_v46 = vpop.eup %763  ;;  %v691_v56 = vsel %vm672_vm3, %v690_v55, %v689_v41  ;;  %v635_v6 = vsel %vm233_vm0, %v611_v26, 0.0  ;;  %v702_v1 = vsel %vm233_vm0, %v685_v42, 0.0  ;;  %v589_v52 = vrot.slane %v758_v47, %v1635_v21 }
  0x8c   :  { %v632_v38 = vadd.f32 %v631_v50, %v630_v24  ;;  %v698_v36 = vrot.slane %v764_v46, 1  ;;  %v693_v5 = vsel %vm675_vm4, %v692_v43, %v691_v56  ;;  %v613_v49 = vmul.f32 %v585_v62, %v100_v63 }
  0x8d   :  { %v695_v12 = vsel %vm678_vm5, %v694_v39, %v693_v5  ;;  %v637_v20 = vsel %vm233_vm0, %v612_v22, 0.0  ;;  %v593_v29 = vrot.slane %v760_v44, %v1635_v21  ;;  %v614_v15 = vmul.f32 %v589_v52, %v101_v61 }
  0x8e   :  { %v634_v32 = vadd.f32 %v633_v28, %v632_v38  ;;  %v697_v34 = vsel %vm681_vm6, %v696_v0, %v695_v12  ;;  %v639_v57 = vsel %vm233_vm0, %v613_v49, 0.0  ;;  %v597_v14 = vrot.slane %v762_v27, %v1635_v21 }
  0x8f   :  { %v699_v31 = vsel %vm684_vm7, %v698_v36, %v697_v34  ;;  %v615_v40 = vmul.f32 %v593_v29, %v102_v16  ;;  %v641_v2 = vsel %vm233_vm0, %v614_v15, 0.0  ;;  %v601_v18 = vrot.slane %v764_v46, %v1635_v21 }
  0x90   :  { %v636_v11 = vadd.f32 %v635_v6, %v634_v32  ;;  %v703_v9 = vsel %vm233_vm0, %v699_v31, 0.0  ;;  %v616_v48 = vmul.f32 %v597_v14, %v103_v17 }
  0x91   :  { %v704_v33 = vadd.f32 %v703_v9, %v702_v1  ;;  %v643_v13 = vsel %vm233_vm0, %v615_v40, 0.0  ;;  %v617_v50 = vmul.f32 %v601_v18, %v104_v58 }
  0x92   :  { %v638_v19 = vadd.f32 %v637_v20, %v636_v11  ;;  %v645_v25 = vsel %vm233_vm0, %v616_v48, 0.0 }
  0x93   :  { %v705_v7 = vrot.slane %v704_v33, 4  ;;  %v647_v60 = vsel %vm233_vm0, %v617_v50, 0.0 }
  0x94   :  { %v640_v8 = vadd.f32 %v639_v57, %v638_v19 }
  0x95   :  { %v706_v59 = vadd.f32 %v705_v7, %v704_v33 }
  0x96   :  { %v642_v35 = vadd.f32 %v641_v2, %v640_v8 }
  0x97   :  { %v707_v23 = vrot.slane %v706_v59, 2 }
  0x98   :  { %v644_v24 = vadd.f32 %v643_v13, %v642_v35 }
  0x99   :  { %v708_v47 = vadd.f32 %v707_v23, %v706_v59 }
  0x9a   :  { %v646_v44 = vadd.f32 %v645_v25, %v644_v24 }
  0x9b   :  { %v709_v10 = vrot.slane %v708_v47, 1 }
  0x9c   :  { %v648_v27 = vadd.f32 %v647_v60, %v646_v44 }
  0x9d   :  { %v710_v3 = vadd.f32 %v709_v10, %v708_v47 }
  0x9f   :  { %765 = vrcp.f32 %v710_v3 }
  0xa9   :  { %v766_v45 = vpop.eup %765 }
  0xaa   :  { %v715_v26 = vrot.slane %v766_v45, %v1635_v21 }
  0xac   :  { %v716_v37 = vmul.f32 %v715_v26, %v648_v27 }
  0xae   :  { %717 = vst.msk [vmem:[#allocation3] sm:$0xff] %vm233_vm0, %v716_v37 }
  0xaf   :  { %778 = shalt.err (!%p775_p4)
}
  0xb0   :  { %s779_s20 = scalar_lea.hbm %s1757_s4, 128 }
  0xb1   :  { %p780_p5 = scmp.ne.s32.totalorder %s1757_s4, %s779_s20  ;;  %p783_p6 = scmp.lt.u32.totalorder %s779_s20, %s1757_s4 }
  0xb3   :  { %p785_p7 = pnand %p783_p6, %p780_p5 }
  0xb5   :  { %788 = shalt.err (!%p785_p7)
}
  0xb6   :  { %727 = dma.vmem_to_hbm [thread:$0]  %s725_s18, 128, %s1757_s4, [#allocation4]  }
  0xb7   :  { %789 = dma.done.wait [#allocation4], 128  }
  0xb8   :  { %790 = vsyncadd [#allocation4], 4294967168 }
  0xb9   :  { %731 = vsyncpa [#allocation4], 1 }

</bundles_post_ra>
